<compile_context>
chip_gen: v6e
topology: v6e:2x2x1
jax: 0.10.0
libtpu: 0.0.40
codegen_flags: <defaults>
</compile_context>

<pallas_src>
import jax
import jax.numpy as jnp
from jax.experimental import pallas as pl
from jax.experimental.pallas import tpu as pltpu


# ----------------------------------------------------------------------------
# Kernels
# ----------------------------------------------------------------------------
def _mirt_gather_kernel(
    user_ref,   # [1, tb]      int32 user indices (lane-major)
    item_ref,   # [1, tb]      int32 item indices (lane-major)
    ptab_ref,   # [P, U_pad]   prompt_theta^T (VMEM-resident, DMA'd once)
    atab_ref,   # [D, I_pad]   a_emb^T        (VMEM-resident)
    btab_ref,   # [1, I_pad]   b_emb^T        (VMEM-resident)
    wth_ref,    # [D, P]       folded fc1 weight^T
    bth_ref,    # [D, 1]       folded fc1 bias^T
    wa_ref,     # [D, D]       fc2 a-part weight^T
    ba_ref,     # [D, 1]       effective fc2 bias^T (Conv1d/exr path folded in)
    out_ref,    # [1, tb]
):
    U = ptab_ref.shape[1]
    I = atab_ref.shape[1]
    tb = user_ref.shape[1]
    tdt = ptab_ref.dtype

    # One-hot gather on the MXU: table^T @ onehot -> transposed activations.
    u_oh = (jax.lax.broadcasted_iota(jnp.int32, (U, tb), 0)
            == user_ref[...]).astype(tdt)
    i_oh = (jax.lax.broadcasted_iota(jnp.int32, (I, tb), 0)
            == item_ref[...]).astype(tdt)

    pt_t = jnp.dot(ptab_ref[...], u_oh, preferred_element_type=jnp.float32)   # [P, tb]
    a_t = jnp.dot(atab_ref[...], i_oh, preferred_element_type=jnp.float32)    # [D, tb]
    b_raw = jnp.dot(btab_ref[...], i_oh, preferred_element_type=jnp.float32)  # [1, tb]

    # new_theta^T = sigmoid(W_eff^T @ p_theta^T + b_eff^T)
    theta_t = jax.nn.sigmoid(
        jnp.dot(wth_ref[...], pt_t.astype(wth_ref.dtype),
                preferred_element_type=jnp.float32) + bth_ref[...])
    # new_a^T = sigmoid(wfc2a^T @ a^T + b_a_eff^T)
    a_act_t = jax.nn.sigmoid(
        jnp.dot(wa_ref[...], a_t.astype(wa_ref.dtype),
                preferred_element_type=jnp.float32) + ba_ref[...])

    # irt2pl: sigmoid(sum(a*theta) - sigmoid(b)); lane-dense [1, tb] store.
    logits = jnp.sum(a_act_t * theta_t, axis=0, keepdims=True)
    out_ref[...] = jax.nn.sigmoid(
        logits - jax.nn.sigmoid(b_raw)).astype(out_ref.dtype)


def _mirt_stream_kernel(
    pt_ref,    # [tb, P]  batch-major p_theta block (f32 or bf16)
    a_ref,     # [tb, D]  batch-major a block
    b_ref,     # [1, tb]  raw b (lane-major, f32)
    wth_ref,   # [D, P]
    bth_ref,   # [D, 1]
    wa_ref,    # [D, D]
    ba_ref,    # [D, 1]
    out_ref,   # [1, tb]
):
    # Contract the feature (last) axis of both operands: [D,P] x [tb,P] -> [D,tb].
    dn = (((1,), (1,)), ((), ()))
    theta_t = jax.nn.sigmoid(
        jax.lax.dot_general(wth_ref[...], pt_ref[...], dn,
                            preferred_element_type=jnp.float32) + bth_ref[...])
    a_act_t = jax.nn.sigmoid(
        jax.lax.dot_general(wa_ref[...], a_ref[...], dn,
                            preferred_element_type=jnp.float32) + ba_ref[...])
    logits = jnp.sum(a_act_t * theta_t, axis=0, keepdims=True)
    out_ref[...] = jax.nn.sigmoid(
        logits - jax.nn.sigmoid(b_ref[...])).astype(out_ref.dtype)


# ----------------------------------------------------------------------------
# Batch-invariant parameter folding (call once per parameter set)
# ----------------------------------------------------------------------------
def _round_up(x, m):
    return (x + m - 1) // m * m


def fold_params(params, *, stream_dtype=jnp.float32, gather_in_kernel=None):
    """Hoists all batch-invariant work out of the per-call forward path."""
    U, P = params["prompt_theta"].shape
    I, D = params["a_emb"].shape
    if gather_in_kernel is None:
        gather_in_kernel = (U <= 1024) and (I <= 1024)

    # new_theta = p_theta @ W_eff + b_eff  (fc1 o generalize_layer_theta folded)
    w_eff = params["wfc1p"] + params["wg"] @ params["wfc1t"]            # [P, D]
    b_eff = params["bfc1"] + params["bg"] @ params["wfc1t"]             # [1, D]
    # Conv1d / exr path is batch-invariant -> fold into an effective fc2 bias.
    exr_row = (jnp.sum(params["conv_w"] * params["s_vecs"], axis=0, keepdims=True)
               + params["conv_b"])                                       # [1, P]
    b_a_eff = exr_row @ params["wfc2p"] + params["bfc2"]                 # [1, D]

    wdt = jnp.float32 if gather_in_kernel else stream_dtype
    folded = {
        "wth_t": w_eff.T.astype(wdt),            # [D, P]
        "bth_t": b_eff.T.astype(jnp.float32),    # [D, 1]
        "wa_t": params["wfc2a"].T.astype(wdt),   # [D, D]
        "ba_t": b_a_eff.T.astype(jnp.float32),   # [D, 1]
    }
    if gather_in_kernel:
        # Transposed, lane-padded tables for in-kernel one-hot gather.
        Up, Ip = _round_up(U, 128), _round_up(I, 128)
        folded["ptab"] = jnp.zeros((P, Up), jnp.float32).at[:, :U].set(
            params["prompt_theta"].T)
        folded["atab"] = jnp.zeros((D, Ip), jnp.float32).at[:, :I].set(
            params["a_emb"].T)
        folded["btab"] = jnp.zeros((1, Ip), jnp.float32).at[:, :I].set(
            params["b_emb"].T)
    else:
        folded["prompt_theta"] = params["prompt_theta"].astype(stream_dtype)
        folded["a_emb"] = params["a_emb"].astype(stream_dtype)
        folded["b_emb"] = params["b_emb"].astype(jnp.float32)
    return folded


def _choose_tiling(B, tb, cap):
    if tb is not None:
        return tb, _round_up(B, tb)
    cands = [c for c in (16384, 8192, 4096, 2048, 1024, 512, 256, 128) if c <= cap]
    # Accept tiles whose batch-padding waste is <= 12.5% (128 always accepted).
    ok = [c for c in cands if c == 128 or ((-B) % c) * 8 <= B]
    # Prefer >= 2 grid steps so "parallel" can use both v7x TensorCores.
    multi = [c for c in ok if _round_up(B, c) // c >= 2]
    tb = (multi or ok or [128])[0]
    return tb, _round_up(B, tb)


# ----------------------------------------------------------------------------
# Forward wrapper
# ----------------------------------------------------------------------------
def mirt_forward(folded, user, item, *, tb=None):
    """Target_MIRTNet2.forward; returns [B] probabilities."""
    B = user.shape[0]
    gather = "ptab" in folded

    if gather:
        P, Up = folded["ptab"].shape
        D, Ip = folded["atab"].shape
        # Keep both one-hot MXU operands ((Up+Ip) x tb x 4B) within ~4 MiB VMEM.
        cap = max(128, min(4096, (4 << 20) // ((Up + Ip) * 4) // 128 * 128))
    else:
        P = folded["prompt_theta"].shape[1]
        D = folded["a_emb"].shape[1]
        cap = 16384

    tb, B_pad = _choose_tiling(B, tb, cap)
    G = B_pad // tb
    pad = B_pad - B

    user_i = jnp.pad(user.astype(jnp.int32), (0, pad))
    item_i = jnp.pad(item.astype(jnp.int32), (0, pad))

    weights = (folded["wth_t"], folded["bth_t"], folded["wa_t"], folded["ba_t"])
    w_specs = [
        pl.BlockSpec((D, P), lambda i: (0, 0)),
        pl.BlockSpec((D, 1), lambda i: (0, 0)),
        pl.BlockSpec((D, D), lambda i: (0, 0)),
        pl.BlockSpec((D, 1), lambda i: (0, 0)),
    ]
    lane_spec = pl.BlockSpec((1, tb), lambda i: (0, i))

    if gather:
        operands = (
            user_i.reshape(1, B_pad), item_i.reshape(1, B_pad),
            folded["ptab"], folded["atab"], folded["btab"],
        ) + weights
        in_specs = [
            lane_spec, lane_spec,
            pl.BlockSpec((P, Up), lambda i: (0, 0)),
            pl.BlockSpec((D, Ip), lambda i: (0, 0)),
            pl.BlockSpec((1, Ip), lambda i: (0, 0)),
        ] + w_specs
        kernel = _mirt_gather_kernel
    else:
        # Batch-major gathered activations: no wrapper-side transpose pass.
        pt = folded["prompt_theta"][user_i]                  # [B_pad, P]
        a = folded["a_emb"][item_i]                          # [B_pad, D]
        b_row = folded["b_emb"][item_i][:, 0].reshape(1, B_pad)
        operands = (pt, a, b_row) + weights
        in_specs = [
            pl.BlockSpec((tb, P), lambda i: (i, 0)),
            pl.BlockSpec((tb, D), lambda i: (i, 0)),
            lane_spec,
        ] + w_specs
        kernel = _mirt_stream_kernel

    out = pl.pallas_call(
        kernel,
        out_shape=jax.ShapeDtypeStruct((1, B_pad), jnp.float32),
        grid=(G,),
        in_specs=in_specs,
        out_specs=lane_spec,
        compiler_params=pltpu.CompilerParams(
            dimension_semantics=("parallel",)),
    )(*operands)
    return out[0, :B]


# ----------------------------------------------------------------------------
# Pure-JAX reference (unfused) of the PyTorch forward, for verification
# ----------------------------------------------------------------------------
def mirt_forward_ref(params, user, item):
    p_theta = params["prompt_theta"][user]
    a_emb = params["a_emb"][item]
    b_emb = params["b_emb"][item][:, 0]

    theta = p_theta @ params["wg"] + params["bg"]
    new_theta = jnp.concatenate([p_theta, theta], axis=1) @ jnp.concatenate(
        [params["wfc1p"], params["wfc1t"]], axis=0
    ) + params["bfc1"]

    exr = jnp.sum(params["conv_w"] * params["s_vecs"], axis=0) + params["conv_b"][0]
    exr_b = jnp.broadcast_to(exr[None, :], (a_emb.shape[0], exr.shape[0]))
    new_a = jnp.concatenate([exr_b, a_emb], axis=1) @ jnp.concatenate(
        [params["wfc2p"], params["wfc2a"]], axis=0
    ) + params["bfc2"]

    new_theta = jax.nn.sigmoid(new_theta)
    new_a = jax.nn.sigmoid(new_a)
    new_b = jax.nn.sigmoid(b_emb)
    return 1.0 / (1.0 + jnp.exp(-jnp.sum(new_a * new_theta, axis=-1) + new_b))


def init_params(key, *, user_num, item_num, latent_dim, pp_dim, n_s_ranges):
    ks = jax.random.split(key, 16)
    u = lambda k, shape, lo, hi: jax.random.uniform(
        k, shape, jnp.float32, minval=lo, maxval=hi)
    P, D = pp_dim, latent_dim
    k_lin1 = 1.0 / jnp.sqrt(P)            # generalize_layer_theta: in=P
    k_fc = 1.0 / jnp.sqrt(P + D)          # fc1/fc2: in=P+D
    k_conv = 1.0 / jnp.sqrt(n_s_ranges)   # Conv1d: in_ch*ks = S
    return {
        "prompt_theta": jax.random.normal(ks[0], (user_num, P), jnp.float32),
        "a_emb": jax.random.normal(ks[1], (item_num, D), jnp.float32),
        "b_emb": jax.random.normal(ks[2], (item_num, 1), jnp.float32),
        "s_vecs": u(ks[3], (n_s_ranges, P), 0.0, 1.0),
        "conv_w": u(ks[4], (n_s_ranges, 1), -k_conv, k_conv),
        "conv_b": u(ks[5], (1, 1), -k_conv, k_conv),
        "wg": u(ks[6], (P, D), -k_lin1, k_lin1),
        "bg": u(ks[7], (1, D), -k_lin1, k_lin1),
        "wfc1p": u(ks[8], (P, D), -k_fc, k_fc),
        "wfc1t": u(ks[9], (D, D), -k_fc, k_fc),
        "bfc1": u(ks[10], (1, D), -k_fc, k_fc),
        "wfc2p": u(ks[11], (P, D), -k_fc, k_fc),
        "wfc2a": u(ks[12], (D, D), -k_fc, k_fc),
        "bfc2": u(ks[13], (1, D), -k_fc, k_fc),
    }


if __name__ == "__main__":
    user_num, item_num = 10, 20
    latent_dim, pp_dim = 32, 16
    s_ranges = [0, 1, 2]
    B = 16

    key = jax.random.PRNGKey(0)
    kp, ku, ki = jax.random.split(key, 3)
    params = init_params(kp, user_num=user_num, item_num=item_num,
                         latent_dim=latent_dim, pp_dim=pp_dim,
                         n_s_ranges=len(s_ranges))
    user = jax.random.randint(ku, (B,), 0, user_num)
    item = jax.random.randint(ki, (B,), 0, item_num)

    ref = mirt_forward_ref(params, user, item)

    # Path A: in-kernel one-hot gather (default for small embedding tables).
    folded_a = fold_params(params)
    out_a = jax.block_until_ready(jax.jit(mirt_forward)(folded_a, user, item))
    assert out_a.shape == (B,)
    assert jnp.allclose(out_a, ref, atol=2e-5, rtol=2e-5), (out_a, ref)

    # Path B: batch-major streaming (used when the tables don't fit VMEM).
    folded_b = fold_params(params, gather_in_kernel=False)
    out_b = jax.block_until_ready(jax.jit(mirt_forward)(folded_b, user, item))
    assert jnp.allclose(out_b, ref, atol=2e-5, rtol=2e-5), (out_b, ref)

    # Path B with bf16 streaming (halves HBM traffic); looser tolerance.
    folded_c = fold_params(params, gather_in_kernel=False,
                           stream_dtype=jnp.bfloat16)
    out_c = jax.block_until_ready(jax.jit(mirt_forward)(folded_c, user, item))
    assert jnp.allclose(out_c, ref, atol=5e-2), (out_c, ref)

    print("KERNEL_OK")
</pallas_src>

<mosaic_0001>
module attributes {stable_mosaic.version = 11 : i64} {
  func.func @_mirt_gather_kernel(%arg0: i32, %arg1: memref<1x128xi32, #tpu.memory_space<vmem>>, %arg2: memref<1x128xi32, #tpu.memory_space<vmem>>, %arg3: memref<16x128xf32, #tpu.memory_space<vmem>>, %arg4: memref<32x128xf32, #tpu.memory_space<vmem>>, %arg5: memref<1x128xf32, #tpu.memory_space<vmem>>, %arg6: memref<32x16xf32, #tpu.memory_space<vmem>>, %arg7: memref<32x1xf32, #tpu.memory_space<vmem>>, %arg8: memref<32x32xf32, #tpu.memory_space<vmem>>, %arg9: memref<32x1xf32, #tpu.memory_space<vmem>>, %arg10: memref<1x128xf32, #tpu.memory_space<vmem>>) attributes {dimension_semantics = [#tpu.dimension_semantics<parallel>], iteration_bounds = array<i64: 1>, scalar_prefetch = 0 : i64, scratch_operands = 0 : i64, tpu.core_type = #tpu.core_type<tc>, window_params = [{transform_indices = @transform_0, window_bounds = array<i64: 1, 128>}, {transform_indices = @transform_1, window_bounds = array<i64: 1, 128>}, {pipeline_mode = #tpu.pipeline_mode<synchronous>, transform_indices = @transform_2, window_bounds = array<i64: 16, 128>}, {pipeline_mode = #tpu.pipeline_mode<synchronous>, transform_indices = @transform_3, window_bounds = array<i64: 32, 128>}, {pipeline_mode = #tpu.pipeline_mode<synchronous>, transform_indices = @transform_4, window_bounds = array<i64: 1, 128>}, {pipeline_mode = #tpu.pipeline_mode<synchronous>, transform_indices = @transform_5, window_bounds = array<i64: 32, 16>}, {pipeline_mode = #tpu.pipeline_mode<synchronous>, transform_indices = @transform_6, window_bounds = array<i64: 32, 1>}, {pipeline_mode = #tpu.pipeline_mode<synchronous>, transform_indices = @transform_7, window_bounds = array<i64: 32, 32>}, {pipeline_mode = #tpu.pipeline_mode<synchronous>, transform_indices = @transform_8, window_bounds = array<i64: 32, 1>}, {transform_indices = @transform_9, window_bounds = array<i64: 1, 128>}]} {
    %0 = tpu.iota {dimensions = array<i32: 0>} : vector<128x128xi32>
    %c0 = arith.constant 0 : index
    %c0_0 = arith.constant 0 : index
    %1 = vector.load %arg1[%c0, %c0_0] : memref<1x128xi32, #tpu.memory_space<vmem>>, vector<1x128xi32>
    %2 = vector.broadcast %1 : vector<1x128xi32> to vector<128x128xi32>
    %3 = arith.cmpi eq, %0, %2 : vector<128x128xi32>
    %4 = arith.extui %3 : vector<128x128xi1> to vector<128x128xi32>
    %5 = arith.sitofp %4 : vector<128x128xi32> to vector<128x128xf32>
    %6 = tpu.iota {dimensions = array<i32: 0>} : vector<128x128xi32>
    %c0_1 = arith.constant 0 : index
    %c0_2 = arith.constant 0 : index
    %7 = vector.load %arg2[%c0_1, %c0_2] : memref<1x128xi32, #tpu.memory_space<vmem>>, vector<1x128xi32>
    %8 = vector.broadcast %7 : vector<1x128xi32> to vector<128x128xi32>
    %9 = arith.cmpi eq, %6, %8 : vector<128x128xi32>
    %10 = arith.extui %9 : vector<128x128xi1> to vector<128x128xi32>
    %11 = arith.sitofp %10 : vector<128x128xi32> to vector<128x128xf32>
    %c0_3 = arith.constant 0 : index
    %c0_4 = arith.constant 0 : index
    %12 = vector.load %arg3[%c0_3, %c0_4] : memref<16x128xf32, #tpu.memory_space<vmem>>, vector<16x128xf32>
    %cst = arith.constant dense<0.000000e+00> : vector<16x128xf32>
    %13 = tpu.matmul %12, %5, %cst {dimension_numbers = #tpu.dot_dimension_numbers<[1], [0], [0], [1], [0, 0, 1, 1], [], []>} : vector<16x128xf32>, vector<128x128xf32>, vector<16x128xf32> -> vector<16x128xf32>
    %c0_5 = arith.constant 0 : index
    %c0_6 = arith.constant 0 : index
    %14 = vector.load %arg4[%c0_5, %c0_6] : memref<32x128xf32, #tpu.memory_space<vmem>>, vector<32x128xf32>
    %cst_7 = arith.constant dense<0.000000e+00> : vector<32x128xf32>
    %15 = tpu.matmul %14, %11, %cst_7 {dimension_numbers = #tpu.dot_dimension_numbers<[1], [0], [0], [1], [0, 0, 1, 1], [], []>} : vector<32x128xf32>, vector<128x128xf32>, vector<32x128xf32> -> vector<32x128xf32>
    %c0_8 = arith.constant 0 : index
    %c0_9 = arith.constant 0 : index
    %16 = vector.load %arg5[%c0_8, %c0_9] : memref<1x128xf32, #tpu.memory_space<vmem>>, vector<1x128xf32>
    %cst_10 = arith.constant dense<0.000000e+00> : vector<1x128xf32>
    %17 = tpu.matmul %16, %11, %cst_10 {dimension_numbers = #tpu.dot_dimension_numbers<[1], [0], [0], [1], [0, 0, 1, 1], [], []>} : vector<1x128xf32>, vector<128x128xf32>, vector<1x128xf32> -> vector<1x128xf32>
    %c0_11 = arith.constant 0 : index
    %c0_12 = arith.constant 0 : index
    %18 = vector.load %arg6[%c0_11, %c0_12] : memref<32x16xf32, #tpu.memory_space<vmem>>, vector<32x16xf32>
    %cst_13 = arith.constant dense<0.000000e+00> : vector<32x128xf32>
    %19 = tpu.matmul %18, %13, %cst_13 {dimension_numbers = #tpu.dot_dimension_numbers<[1], [0], [0], [1], [0, 0, 1, 1], [], []>} : vector<32x16xf32>, vector<16x128xf32>, vector<32x128xf32> -> vector<32x128xf32>
    %c0_14 = arith.constant 0 : index
    %c0_15 = arith.constant 0 : index
    %20 = vector.load %arg7[%c0_14, %c0_15] : memref<32x1xf32, #tpu.memory_space<vmem>>, vector<32x1xf32>
    %21 = vector.broadcast %20 : vector<32x1xf32> to vector<32x128xf32>
    %22 = arith.addf %19, %21 : vector<32x128xf32>
    %23 = arith.negf %22 : vector<32x128xf32>
    %24 = math.exp %23 : vector<32x128xf32>
    %cst_16 = arith.constant 1.000000e+00 : f32
    %25 = vector.broadcast %cst_16 : f32 to vector<32x128xf32>
    %26 = arith.addf %25, %24 : vector<32x128xf32>
    %27 = arith.divf %25, %26 : vector<32x128xf32>
    %c0_17 = arith.constant 0 : index
    %c0_18 = arith.constant 0 : index
    %28 = vector.load %arg8[%c0_17, %c0_18] : memref<32x32xf32, #tpu.memory_space<vmem>>, vector<32x32xf32>
    %cst_19 = arith.constant dense<0.000000e+00> : vector<32x128xf32>
    %29 = tpu.matmul %28, %15, %cst_19 {dimension_numbers = #tpu.dot_dimension_numbers<[1], [0], [0], [1], [0, 0, 1, 1], [], []>} : vector<32x32xf32>, vector<32x128xf32>, vector<32x128xf32> -> vector<32x128xf32>
    %c0_20 = arith.constant 0 : index
    %c0_21 = arith.constant 0 : index
    %30 = vector.load %arg9[%c0_20, %c0_21] : memref<32x1xf32, #tpu.memory_space<vmem>>, vector<32x1xf32>
    %31 = vector.broadcast %30 : vector<32x1xf32> to vector<32x128xf32>
    %32 = arith.addf %29, %31 : vector<32x128xf32>
    %33 = arith.negf %32 : vector<32x128xf32>
    %34 = math.exp %33 : vector<32x128xf32>
    %cst_22 = arith.constant 1.000000e+00 : f32
    %35 = vector.broadcast %cst_22 : f32 to vector<32x128xf32>
    %36 = arith.addf %35, %34 : vector<32x128xf32>
    %37 = arith.divf %35, %36 : vector<32x128xf32>
    %38 = arith.mulf %37, %27 : vector<32x128xf32>
    %cst_23 = arith.constant dense<0.000000e+00> : vector<128xf32>
    %39 = vector.multi_reduction <add>, %38, %cst_23 [0] : vector<32x128xf32> to vector<128xf32>
    %40 = vector.shape_cast %39 : vector<128xf32> to vector<1x128xf32>
    %41 = arith.negf %17 : vector<1x128xf32>
    %42 = math.exp %41 : vector<1x128xf32>
    %cst_24 = arith.constant 1.000000e+00 : f32
    %43 = vector.broadcast %cst_24 : f32 to vector<1x128xf32>
    %44 = arith.addf %43, %42 : vector<1x128xf32>
    %45 = arith.divf %43, %44 : vector<1x128xf32>
    %46 = arith.subf %40, %45 : vector<1x128xf32>
    %47 = arith.negf %46 : vector<1x128xf32>
    %48 = math.exp %47 : vector<1x128xf32>
    %cst_25 = arith.constant 1.000000e+00 : f32
    %49 = vector.broadcast %cst_25 : f32 to vector<1x128xf32>
    %50 = arith.addf %49, %48 : vector<1x128xf32>
    %51 = arith.divf %49, %50 : vector<1x128xf32>
    %c0_26 = arith.constant 0 : index
    %c0_27 = arith.constant 0 : index
    %52 = vector.load %arg10[%c0_26, %c0_27] : memref<1x128xf32, #tpu.memory_space<vmem>>, vector<1x128xf32>
    tpu.vector_store %arg10[%c0_26, %c0_27], %51 {strides = array<i32>} : memref<1x128xf32, #tpu.memory_space<vmem>>, vector<1x128xf32>,
    return
  }
  func.func @transform_0(%arg0: i32) -> (i32, i32) {
    %c0_i32 = arith.constant 0 : i32
    %c0_i32_0 = arith.constant 0 : i32
    return %c0_i32, %arg0 : i32, i32
  }
  func.func @transform_1(%arg0: i32) -> (i32, i32) {
    %c0_i32 = arith.constant 0 : i32
    %c0_i32_0 = arith.constant 0 : i32
    return %c0_i32, %arg0 : i32, i32
  }
  func.func @transform_2(%arg0: i32) -> (i32, i32) {
    %c0_i32 = arith.constant 0 : i32
    %c0_i32_0 = arith.constant 0 : i32
    %c0_i32_1 = arith.constant 0 : i32
    return %c0_i32, %c0_i32_0 : i32, i32
  }
  func.func @transform_3(%arg0: i32) -> (i32, i32) {
    %c0_i32 = arith.constant 0 : i32
    %c0_i32_0 = arith.constant 0 : i32
    %c0_i32_1 = arith.constant 0 : i32
    return %c0_i32, %c0_i32_0 : i32, i32
  }
  func.func @transform_4(%arg0: i32) -> (i32, i32) {
    %c0_i32 = arith.constant 0 : i32
    %c0_i32_0 = arith.constant 0 : i32
    %c0_i32_1 = arith.constant 0 : i32
    return %c0_i32, %c0_i32_0 : i32, i32
  }
  func.func @transform_5(%arg0: i32) -> (i32, i32) {
    %c0_i32 = arith.constant 0 : i32
    %c0_i32_0 = arith.constant 0 : i32
    %c0_i32_1 = arith.constant 0 : i32
    return %c0_i32, %c0_i32_0 : i32, i32
  }
  func.func @transform_6(%arg0: i32) -> (i32, i32) {
    %c0_i32 = arith.constant 0 : i32
    %c0_i32_0 = arith.constant 0 : i32
    %c0_i32_1 = arith.constant 0 : i32
    return %c0_i32, %c0_i32_0 : i32, i32
  }
  func.func @transform_7(%arg0: i32) -> (i32, i32) {
    %c0_i32 = arith.constant 0 : i32
    %c0_i32_0 = arith.constant 0 : i32
    %c0_i32_1 = arith.constant 0 : i32
    return %c0_i32, %c0_i32_0 : i32, i32
  }
  func.func @transform_8(%arg0: i32) -> (i32, i32) {
    %c0_i32 = arith.constant 0 : i32
    %c0_i32_0 = arith.constant 0 : i32
    %c0_i32_1 = arith.constant 0 : i32
    return %c0_i32, %c0_i32_0 : i32, i32
  }
  func.func @transform_9(%arg0: i32) -> (i32, i32) {
    %c0_i32 = arith.constant 0 : i32
    %c0_i32_0 = arith.constant 0 : i32
    return %c0_i32, %arg0 : i32, i32
  }
}

</mosaic_0001>

<bundles_post_ra>
// kernel: mirt_forward.1
= control target key start
LH: loop header
LB: loop body
LE: loop exit
PB: predicated region body
PF: predicated region fallthrough
CT: control target
= control target key end

     0   :  { %v32_v0 = vlaneseq  ;;  %v1070_v10 = vmov 1.0   ;;  %v1071_v27 = vmov 0.0   ;;  %v1073_v29 = vmov 0   ;;  %s1545_s0 = inlined_call_operand.vmem [shape: s32[1,128], index: 0, kind: input, shape index: {}]   ;;  %s1546_s1 = inlined_call_operand.vmem [shape: s32[1,128], index: 1, kind: input, shape index: {}]   ;;  %s1547_s2 = inlined_call_operand.vmem [shape: f32[16,128], index: 2, kind: input, shape index: {}]   ;;  %s1548_s3 = inlined_call_operand.vmem [shape: f32[32,128], index: 3, kind: input, shape index: {}]   ;;  %s1549_s5 = inlined_call_operand.vmem [shape: f32[32,16], index: 5, kind: input, shape index: {}]   ;;  %s1550_s8 = inlined_call_operand.vmem [shape: f32[32,1], index: 8, kind: input, shape index: {}]   ;;  %s1551_s6 = inlined_call_operand.vmem [shape: f32[32,1], index: 6, kind: input, shape index: {}]   ;;  %s1552_s4 = inlined_call_operand.vmem [shape: f32[1,128], index: 4, kind: input, shape index: {}]   ;;  %s1553_s7 = inlined_call_operand.vmem [shape: f32[32,32], index: 7, kind: input, shape index: {}]   ;;  %s1554_s9 = inlined_call_operand.vmem [shape: f32[1,128], index: 9, kind: output, shape index: {}]  }
   0x1   :  { %v155_v1 = vld [vmem:[%s1547_s2] sm:$0xff]  ;;  %v156_v22 = vld [vmem:[%s1547_s2 + $0x8] sm:$0xff]  ;;  %v234_v24 = vld [vmem:[%s1548_s3 + $0x10] sm:$0xff]  ;;  %1029 = vset.pattern.permute.xlu1 %v1073_v29  ;;  %1028 = vset.pattern.permute.xlu0 %v1073_v29 }
   0x2   :  { %v1127_v2 = vshrl.u32 %v32_v0, 7  ;;  %924 = vmatprep.mubr.f32.mxu0 %v155_v1  ;;  %v232_v3 = vld [vmem:[%s1548_s3] sm:$0xff]  ;;  %v233_v23 = vld [vmem:[%s1548_s3 + $0x8] sm:$0xff]  ;;  %v235_v25 = vld [vmem:[%s1548_s3 + $0x18] sm:$0xff] }
   0x3   :  { %v1135_v4 = vld [vmem:[%s1545_s0] ss:$0 sm:$0xff]  ;;  %959 = vmatprep.mubr.f32.mxu1 %v232_v3  ;;  %v547_v31 = vld [vmem:[%s1550_s8 + $0x8] sm:$0xff]  ;;  %v548_v33 = vld [vmem:[%s1550_s8 + $0x10] sm:$0xff] }
   0x4   :  { %v1140_v5 = vld [vmem:[%s1546_s1] ss:$0 sm:$0xff]  ;;  %v1143_v6 = vadd.s32 120, %v1127_v2  ;;  %v1146_v7 = vadd.s32 112, %v1127_v2  ;;  %v1149_v8 = vadd.s32 104, %v1127_v2  ;;  %v1152_v9 = vadd.s32 96, %v1127_v2 }
   0x5   :  { %v1177_v11 = vadd.s32 88, %v1127_v2  ;;  %v1194_v12 = vadd.s32 80, %v1127_v2  ;;  %v1211_v13 = vadd.s32 72, %v1127_v2  ;;  %v1228_v14 = vadd.s32 64, %v1127_v2  ;;  %v392_v26 = vld [vmem:[%s1549_s5] sm:$0xff]  ;;  %v397_v32 = vld [vmem:[%s1551_s6 + $0x8] sm:$0xff] }
   0x6   :  { %vm69_vm0 = vcmp.eq.s32.totalorder %v1143_v6, %v1135_v4  ;;  %vm122_vm1 = vcmp.eq.s32.totalorder %v1143_v6, %v1140_v5  ;;  %vm68_vm2 = vcmp.eq.s32.totalorder %v1146_v7, %v1135_v4  ;;  %vm121_vm3 = vcmp.eq.s32.totalorder %v1146_v7, %v1140_v5  ;;  %v546_v28 = vld [vmem:[%s1550_s8] sm:$0xff]  ;;  %v398_v34 = vld [vmem:[%s1551_s6 + $0x10] sm:$0xff]  ;;  %v549_v35 = vld [vmem:[%s1550_s8 + $0x18] sm:$0xff] }
   0x7   :  { %892 = vmatprep.subr.msk.mxu0 %vm69_vm0, %v1070_v10  ;;  %927 = vmatprep.subr.msk.mxu1 %vm122_vm1, %v1070_v10  ;;  %vm67_vm4 = vcmp.eq.s32.totalorder %v1149_v8, %v1135_v4  ;;  %vm120_vm5 = vcmp.eq.s32.totalorder %v1149_v8, %v1140_v5  ;;  %vm66_vm6 = vcmp.eq.s32.totalorder %v1152_v9, %v1135_v4  ;;  %v1245_v15 = vadd.s32 56, %v1127_v2  ;;  %v396_v30 = vld [vmem:[%s1551_s6] sm:$0xff]  ;;  %v399_v36 = vld [vmem:[%s1551_s6 + $0x18] sm:$0xff]  ;;  %v393_v42 = vld [vmem:[%s1549_s5 + $0x8] sm:$0xff] }
   0x8   :  { %893 = vmatpush3.msk.msra.mxu0 %vm69_vm0, %v1070_v10  ;;  %928 = vmatpush3.msk.msra.mxu1 %vm122_vm1, %v1070_v10  ;;  %vm119_vm7 = vcmp.eq.s32.totalorder %v1152_v9, %v1140_v5  ;;  %vm65_vm8 = vcmp.eq.s32.totalorder %v1177_v11, %v1135_v4  ;;  %vm118_vm9 = vcmp.eq.s32.totalorder %v1177_v11, %v1140_v5  ;;  %v1262_v16 = vadd.s32 48, %v1127_v2  ;;  %v321_v37 = vld [vmem:[%s1552_s4] sm:$0x1]  ;;  %v394_v43 = vld [vmem:[%s1549_s5 + $0x10] sm:$0xff]  ;;  %v395_v46 = vld [vmem:[%s1549_s5 + $0x18] sm:$0xff] }
   0x9   :  { %894 = vmatprep.subr.msk.mxu0 %vm68_vm2, %v1070_v10  ;;  %929 = vmatprep.subr.msk.mxu1 %vm121_vm3, %v1070_v10  ;;  %vm64_vm10 = vcmp.eq.s32.totalorder %v1194_v12, %v1135_v4  ;;  %vm117_vm11 = vcmp.eq.s32.totalorder %v1194_v12, %v1140_v5  ;;  %vm63_vm12 = vcmp.eq.s32.totalorder %v1211_v13, %v1135_v4  ;;  %v1279_v17 = vadd.s32 40, %v1127_v2  ;;  %v542_v47 = vld [vmem:[%s1553_s7] sm:$0xff]  ;;  %v543_v48 = vld [vmem:[%s1553_s7 + $0x8] sm:$0xff]  ;;  %v544_v49 = vld [vmem:[%s1553_s7 + $0x10] sm:$0xff] }
   0xa   :  { %895 = vmatpush3.msk.msra.mxu0 %vm68_vm2, %v1070_v10  ;;  %930 = vmatpush3.msk.msra.mxu1 %vm121_vm3, %v1070_v10  ;;  %vm116_vm13 = vcmp.eq.s32.totalorder %v1211_v13, %v1140_v5  ;;  %vm62_vm14 = vcmp.eq.s32.totalorder %v1228_v14, %v1135_v4  ;;  %vm115_vm15 = vcmp.eq.s32.totalorder %v1228_v14, %v1140_v5  ;;  %v1296_v18 = vadd.s32 32, %v1127_v2  ;;  %v545_v50 = vld [vmem:[%s1553_s7 + $0x18] sm:$0xff] }
   0xb   :  { %896 = vmatprep.subr.msk.mxu0 %vm67_vm4, %v1070_v10  ;;  %931 = vmatprep.subr.msk.mxu1 %vm120_vm5, %v1070_v10  ;;  %vm61_vm0 = vcmp.eq.s32.totalorder %v1245_v15, %v1135_v4  ;;  %vm114_vm2 = vcmp.eq.s32.totalorder %v1245_v15, %v1140_v5  ;;  %v1313_v19 = vadd.s32 24, %v1127_v2  ;;  %v1330_v20 = vadd.s32 16, %v1127_v2 }
   0xc   :  { %897 = vmatpush3.msk.msra.mxu0 %vm67_vm4, %v1070_v10  ;;  %932 = vmatpush3.msk.msra.mxu1 %vm120_vm5, %v1070_v10  ;;  %vm60_vm4 = vcmp.eq.s32.totalorder %v1262_v16, %v1135_v4  ;;  %v1347_v21 = vadd.s32 8, %v1127_v2 }
   0xd   :  { %898 = vmatprep.subr.msk.mxu0 %vm66_vm6, %v1070_v10  ;;  %933 = vmatprep.subr.msk.mxu1 %vm119_vm7, %v1070_v10 }
   0xe   :  { %899 = vmatpush3.msk.msra.mxu0 %vm66_vm6, %v1070_v10  ;;  %934 = vmatpush3.msk.msra.mxu1 %vm119_vm7, %v1070_v10  ;;  %vm113_vm6 = vcmp.eq.s32.totalorder %v1262_v16, %v1140_v5 }
   0xf   :  { %900 = vmatprep.subr.msk.mxu0 %vm65_vm8, %v1070_v10  ;;  %935 = vmatprep.subr.msk.mxu1 %vm118_vm9, %v1070_v10 }
  0x10   :  { %901 = vmatpush3.msk.msra.mxu0 %vm65_vm8, %v1070_v10  ;;  %936 = vmatpush3.msk.msra.mxu1 %vm118_vm9, %v1070_v10  ;;  %vm59_vm8 = vcmp.eq.s32.totalorder %v1279_v17, %v1135_v4 }
  0x11   :  { %902 = vmatprep.subr.msk.mxu0 %vm64_vm10, %v1070_v10  ;;  %937 = vmatprep.subr.msk.mxu1 %vm117_vm11, %v1070_v10 }
  0x12   :  { %903 = vmatpush3.msk.msra.mxu0 %vm64_vm10, %v1070_v10  ;;  %938 = vmatpush3.msk.msra.mxu1 %vm117_vm11, %v1070_v10  ;;  %vm1555_vm10 = vcmp.eq.s32.totalorder %v1279_v17, %v1140_v5 }
  0x13   :  { %904 = vmatprep.subr.msk.mxu0 %vm63_vm12, %v1070_v10  ;;  %939 = vmatprep.subr.msk.mxu1 %vm116_vm13, %v1070_v10 }
  0x14   :  { %905 = vmatpush3.msk.msra.mxu0 %vm63_vm12, %v1070_v10  ;;  %940 = vmatpush3.msk.msra.mxu1 %vm116_vm13, %v1070_v10  ;;  %vm58_vm12 = vcmp.eq.s32.totalorder %v1296_v18, %v1135_v4 }
  0x15   :  { %906 = vmatprep.subr.msk.mxu0 %vm62_vm14, %v1070_v10  ;;  %941 = vmatprep.subr.msk.mxu1 %vm115_vm15, %v1070_v10 }
  0x16   :  { %907 = vmatpush3.msk.msra.mxu0 %vm62_vm14, %v1070_v10  ;;  %942 = vmatpush3.msk.msra.mxu1 %vm115_vm15, %v1070_v10  ;;  %vm1556_vm14 = vcmp.eq.s32.totalorder %v1296_v18, %v1140_v5 }
  0x17   :  { %908 = vmatprep.subr.msk.mxu0 %vm61_vm0, %v1070_v10  ;;  %943 = vmatprep.subr.msk.mxu1 %vm114_vm2, %v1070_v10 }
  0x18   :  { %909 = vmatpush3.msk.msra.mxu0 %vm61_vm0, %v1070_v10  ;;  %944 = vmatpush3.msk.msra.mxu1 %vm114_vm2, %v1070_v10  ;;  %vm57_vm0 = vcmp.eq.s32.totalorder %v1313_v19, %v1135_v4 }
  0x19   :  { %910 = vmatprep.subr.msk.mxu0 %vm60_vm4, %v1070_v10  ;;  %945 = vmatprep.subr.msk.mxu1 %vm113_vm6, %v1070_v10 }
  0x1a   :  { %911 = vmatpush3.msk.msra.mxu0 %vm60_vm4, %v1070_v10  ;;  %946 = vmatpush3.msk.msra.mxu1 %vm113_vm6, %v1070_v10  ;;  %vm1557_vm4 = vcmp.eq.s32.totalorder %v1313_v19, %v1140_v5 }
  0x1b   :  { %912 = vmatprep.subr.msk.mxu0 %vm59_vm8, %v1070_v10  ;;  %947 = vmatprep.subr.msk.mxu1 %vm1555_vm10, %v1070_v10 }
  0x1c   :  { %913 = vmatpush3.msk.msra.mxu0 %vm59_vm8, %v1070_v10  ;;  %948 = vmatpush3.msk.msra.mxu1 %vm1555_vm10, %v1070_v10  ;;  %vm56_vm8 = vcmp.eq.s32.totalorder %v1330_v20, %v1135_v4  ;;  %vm109_vm10 = vcmp.eq.s32.totalorder %v1330_v20, %v1140_v5 }
  0x1d   :  { %914 = vmatprep.subr.msk.mxu0 %vm58_vm12, %v1070_v10  ;;  %949 = vmatprep.subr.msk.mxu1 %vm1556_vm14, %v1070_v10 }
  0x1e   :  { %915 = vmatpush3.msk.msra.mxu0 %vm58_vm12, %v1070_v10  ;;  %950 = vmatpush3.msk.msra.mxu1 %vm1556_vm14, %v1070_v10  ;;  %vm55_vm12 = vcmp.eq.s32.totalorder %v1347_v21, %v1135_v4  ;;  %vm108_vm14 = vcmp.eq.s32.totalorder %v1347_v21, %v1140_v5 }
  0x1f   :  { %916 = vmatprep.subr.msk.mxu0 %vm57_vm0, %v1070_v10  ;;  %951 = vmatprep.subr.msk.mxu1 %vm1557_vm4, %v1070_v10 }
  0x20   :  { %917 = vmatpush3.msk.msra.mxu0 %vm57_vm0, %v1070_v10  ;;  %952 = vmatpush3.msk.msra.mxu1 %vm1557_vm4, %v1070_v10  ;;  %vm54_vm0 = vcmp.eq.s32.totalorder %v1127_v2, %v1135_v4  ;;  %vm107_vm4 = vcmp.eq.s32.totalorder %v1127_v2, %v1140_v5 }
  0x21   :  { %918 = vmatprep.subr.msk.mxu0 %vm56_vm8, %v1070_v10  ;;  %953 = vmatprep.subr.msk.mxu1 %vm109_vm10, %v1070_v10 }
  0x22   :  { %919 = vmatpush3.msk.msra.mxu0 %vm56_vm8, %v1070_v10  ;;  %954 = vmatpush3.msk.msra.mxu1 %vm109_vm10, %v1070_v10  ;;  %vm420_vm8 = vcmask 130048  }
  0x23   :  { %920 = vmatprep.subr.msk.mxu0 %vm55_vm12, %v1070_v10  ;;  %955 = vmatprep.subr.msk.mxu1 %vm108_vm14, %v1070_v10 }
  0x24   :  { %921 = vmatpush3.msk.msra.mxu0 %vm55_vm12, %v1070_v10  ;;  %956 = vmatpush3.msk.msra.mxu1 %vm108_vm14, %v1070_v10 }
  0x25   :  { %922 = vmatprep.subr.msk.mxu0 %vm54_vm0, %v1070_v10  ;;  %957 = vmatprep.subr.msk.mxu1 %vm107_vm4, %v1070_v10 }
  0x26   :  { %923 = vmatpush3.msk.msra.mxu0 %vm54_vm0, %v1070_v10  ;;  %958 = vmatpush3.msk.msra.mxu1 %vm107_vm4, %v1070_v10 }
  0x27   :  { %925 = vmatmul.mubr.f32.vlgmr.msra.gmra.mxu0 %v156_v22  ;;  %960 = vmatmul.mubr.f32.vlgmr.msra.gmra.mxu1 %v233_v23 }
  0x28   :  { %962 = vmatprep.mubr.f32.mxu1 %v234_v24  ;;  %965 = vmatprep.subr.mxu0 %v1071_v27 }
  0x29   :  { %966 = vmatpush3.msk.msra.mxu0 %vm122_vm1, %v1070_v10  ;;  %vm1072_vm1 = vmmov 0   ;;  %552 = vperm.xlu1 %1029, %v546_v28  }
  0x2a   :  { %967 = vmatprep.subr.mxu0 %v1071_v27  ;;  %997 = vmatprep.mubr.msk.f32.mxu0 %vm1072_vm1, %v1071_v27 }
  0x2b   :  { %963 = vmatmul.mubr.f32.gmra.mxu1 %v235_v25  ;;  %968 = vmatpush3.msk.msra.mxu0 %vm121_vm3, %v1070_v10  ;;  %vm1558_vm3 = vcmp.eq.s32.totalorder %v1279_v17, %v1140_v5 }
  0x2c   :  { %1004 = vmatprep.mubr.msk.f32.mxu1 %vm420_vm8, %v392_v26  ;;  %969 = vmatprep.subr.mxu0 %v1071_v27 }
  0x2d   :  { %970 = vmatpush3.msk.msra.mxu0 %vm120_vm5, %v1070_v10  ;;  %402 = vperm.xlu0 %1028, %v396_v30   ;;  %vm1559_vm5 = vcmp.eq.s32.totalorder %v1296_v18, %v1140_v5 }
  0x2e   :  { %971 = vmatprep.subr.mxu0 %v1071_v27  ;;  %557 = vperm.xlu1 %1029, %v547_v31  }
  0x2f   :  { %972 = vmatpush3.msk.msra.mxu0 %vm119_vm7, %v1070_v10  ;;  %vm1560_vm7 = vcmp.eq.s32.totalorder %v1313_v19, %v1140_v5 }
  0x30   :  { %973 = vmatprep.subr.mxu0 %v1071_v27 }
  0x31   :  { %974 = vmatpush3.msk.msra.mxu0 %vm118_vm9, %v1070_v10  ;;  %407 = vperm.xlu0 %1028, %v397_v32   ;;  %vm570_vm9 = vcmask 261120  }
  0x32   :  { %975 = vmatprep.subr.mxu0 %v1071_v27  ;;  %562 = vperm.xlu1 %1029, %v548_v33  }
  0x33   :  { %976 = vmatpush3.msk.msra.mxu0 %vm117_vm11, %v1070_v10 }
  0x34   :  { %977 = vmatprep.subr.mxu0 %v1071_v27 }
  0x35   :  { %978 = vmatpush3.msk.msra.mxu0 %vm116_vm13, %v1070_v10  ;;  %412 = vperm.xlu0 %1028, %v398_v34  }
  0x36   :  { %979 = vmatprep.subr.mxu0 %v1071_v27  ;;  %567 = vperm.xlu1 %1029, %v549_v35  }
  0x37   :  { %980 = vmatpush3.msk.msra.mxu0 %vm115_vm15, %v1070_v10 }
  0x38   :  { %981 = vmatprep.subr.mxu0 %v1071_v27 }
  0x39   :  { %982 = vmatpush3.msk.msra.mxu0 %vm114_vm2, %v1070_v10  ;;  %417 = vperm.xlu0 %1028, %v399_v36  }
  0x3a   :  { %983 = vmatprep.subr.mxu0 %v1071_v27 }
  0x3b   :  { %984 = vmatpush3.msk.msra.mxu0 %vm113_vm6, %v1070_v10 }
  0x3c   :  { %985 = vmatprep.subr.mxu0 %v1071_v27 }
  0x3d   :  { %986 = vmatpush3.msk.msra.mxu0 %vm1558_vm3, %v1070_v10 }
  0x3e   :  { %987 = vmatprep.subr.mxu0 %v1071_v27 }
  0x3f   :  { %988 = vmatpush3.msk.msra.mxu0 %vm1559_vm5, %v1070_v10 }
  0x40   :  { %989 = vmatprep.subr.mxu0 %v1071_v27 }
  0x41   :  { %990 = vmatpush3.msk.msra.mxu0 %vm1560_vm7, %v1070_v10 }
  0x42   :  { %991 = vmatprep.subr.mxu0 %v1071_v27 }
  0x43   :  { %992 = vmatpush3.msk.msra.mxu0 %vm109_vm10, %v1070_v10 }
  0x44   :  { %993 = vmatprep.subr.mxu0 %v1071_v27 }
  0x45   :  { %994 = vmatpush3.msk.msra.mxu0 %vm108_vm14, %v1070_v10 }
  0x46   :  { %995 = vmatprep.subr.mxu0 %v1071_v27 }
  0x47   :  { %996 = vmatpush3.msk.msra.mxu0 %vm107_vm4, %v1070_v10 }
  0x48   :  { %998 = vmatmul.mubr.f32.vlgmr.msra.gmra.mxu0 %v321_v37 }
  0xa4   :  { %v553_v55 = vpop.permute.xlu1 %552 }
  0xa8   :  { %v403_v53 = vpop.permute.xlu0 %402 }
  0xa9   :  { %v558_v58 = vpop.permute.xlu1 %557 }
  0xac   :  { %v408_v54 = vpop.permute.xlu0 %407 }
  0xad   :  { %v563_v1 = vpop.permute.xlu1 %562 }
  0xb0   :  { %v413_v56 = vpop.permute.xlu0 %412 }
  0xb1   :  { %v568_v12 = vpop.permute.xlu1 %567 }
  0xb4   :  { %v418_v0 = vpop.permute.xlu0 %417 }
  0xe7   :  { %v926_v38 = vpop.f32.mrf.mxu0  ;;  %v961_v39 = vpop.f32.mrf.mxu1 }
  0xe8   :  { %1000 = vmatprep.subr.mxu1 %v926_v38 }
  0xe9   :  { %v223_v40 = vpop.f32.mrf.mxu0  ;;  %v302_v41 = vpop.f32.mrf.mxu1  ;;  %1001 = vmatpush3.msra.mxu1 %v926_v38 }
  0xea   :  { %1002 = vmatprep.subr.mxu1 %v223_v40 }
  0xeb   :  { %v964_v44 = vpop.f32.mrf.mxu1  ;;  %1003 = vmatpush3.msra.mxu1 %v223_v40 }
  0xec   :  { %1005 = vmatmul.mubr.msk.f32.vlgmr.msra.gmra.mxu1 %vm420_vm8, %v393_v42  ;;  %1010 = vmatprep.subr.mxu1 %v964_v44 }
  0xed   :  { %v312_v45 = vpop.f32.mrf.mxu1  ;;  %1011 = vmatpush3.msra.mxu1 %v964_v44  ;;  %1007 = vmatprep.mubr.msk.f32.mxu1 %vm420_vm8, %v394_v43 }
  0xee   :  { %1012 = vmatprep.subr.mxu1 %v312_v45 }
  0xef   :  { %1013 = vmatpush3.msra.mxu1 %v312_v45 }
  0xf0   :  { %1008 = vmatmul.mubr.msk.f32.gmra.mxu1 %vm420_vm8, %v395_v46  ;;  %1014 = vmatprep.subr.mxu1 %v961_v39 }
  0xf1   :  { %1015 = vmatpush3.msra.mxu1 %v961_v39  ;;  %1018 = vmatprep.mubr.msk.f32.mxu1 %vm570_vm9, %v542_v47 }
  0xf2   :  { %1016 = vmatprep.subr.mxu1 %v302_v41 }
  0xf3   :  { %1017 = vmatpush3.msra.mxu1 %v302_v41 }
  0xf4   :  { %1019 = vmatmul.mubr.msk.f32.vlgmr.msra.gmra.mxu1 %vm570_vm9, %v543_v48 }
  0xf5   :  { %1021 = vmatprep.mubr.msk.f32.mxu1 %vm570_vm9, %v544_v49 }
  0xf8   :  { %1022 = vmatmul.mubr.msk.f32.gmra.mxu1 %vm570_vm9, %v545_v50 }
 0x108   :  { %v388_v51 = vpop.f32.mrf.mxu0 }
 0x109   :  { %v821_v23 = vmul.f32 -1.442695, %v388_v51 }
 0x10a   :  { %v999_v52 = vpop.f32.mrf.mxu0 }
 0x1ac   :  { %v1006_v57 = vpop.f32.mrf.mxu1 }
 0x1ad   :  { %v505_v60 = vadd.f32 %v1006_v57, %v408_v54 }
 0x1ae   :  { %v499_v59 = vpop.f32.mrf.mxu1 }
 0x1af   :  { %v500_v61 = vadd.f32 %v499_v59, %v403_v53  ;;  %v810_v3 = vmul.f32 -1.442695, %v505_v60 }
 0x1b0   :  { %v1009_v62 = vpop.f32.mrf.mxu1 }
 0x1b1   :  { %v809_v63 = vmul.f32 -1.442695, %v500_v61  ;;  %v515_v6 = vadd.f32 %v1009_v62, %v418_v0 }
 0x1b2   :  { %v509_v2 = vpop.f32.mrf.mxu1 }
 0x1b3   :  { %v510_v4 = vadd.f32 %v509_v2, %v413_v56  ;;  %1030 = vpow2.f32 %v809_v63  ;;  %v812_v13 = vmul.f32 -1.442695, %v515_v6 }
 0x1b4   :  { %v1020_v5 = vpop.f32.mrf.mxu1  ;;  %1032 = vpow2.f32 %v810_v3 }
 0x1b5   :  { %v811_v7 = vmul.f32 -1.442695, %v510_v4  ;;  %v655_v8 = vadd.f32 %v1020_v5, %v558_v58 }
 0x1b6   :  { %v649_v9 = vpop.f32.mrf.mxu1 }
 0x1b7   :  { %v818_v10 = vmul.f32 -1.442695, %v655_v8  ;;  %v650_v11 = vadd.f32 %v649_v9, %v553_v55  ;;  %1034 = vpow2.f32 %v811_v7 }
 0x1b8   :  { %v1023_v14 = vpop.f32.mrf.mxu1 }
 0x1b9   :  { %1036 = vpow2.f32 %v818_v10  ;;  %v817_v15 = vmul.f32 -1.442695, %v650_v11  ;;  %v665_v16 = vadd.f32 %v1023_v14, %v568_v12 }
 0x1ba   :  { %v659_v17 = vpop.f32.mrf.mxu1 }
 0x1bb   :  { %1038 = vpow2.f32 %v817_v15  ;;  %v820_v18 = vmul.f32 -1.442695, %v665_v16  ;;  %v660_v19 = vadd.f32 %v659_v17, %v563_v1 }
 0x1bc   :  { %1040 = vpow2.f32 %v812_v13 }
 0x1bd   :  { %1042 = vpow2.f32 %v820_v18  ;;  %v819_v20 = vmul.f32 -1.442695, %v660_v19 }
 0x1bf   :  { %1044 = vpow2.f32 %v819_v20 }
 0x1c0   :  { %v1031_v21 = vpop.eup %1030  ;;  %1046 = vpow2.f32 %v821_v23 }
 0x1c1   :  { %v1033_v22 = vpop.eup %1032  ;;  %v530_v25 = vadd.f32 1.0, %v1031_v21 }
 0x1c2   :  { %v531_v29 = vadd.f32 1.0, %v1033_v22 }
 0x1c3   :  { %1048 = vrcp.f32 %v530_v25 }
 0x1c4   :  { %v1035_v24 = vpop.eup %1034 }
 0x1c5   :  { %v532_v31 = vadd.f32 1.0, %v1035_v24 }
 0x1c6   :  { %v1037_v26 = vpop.eup %1036 }
 0x1c7   :  { %v681_v27 = vadd.f32 1.0, %v1037_v26 }
 0x1c8   :  { %v1039_v28 = vpop.eup %1038 }
 0x1c9   :  { %v1041_v30 = vpop.eup %1040  ;;  %v680_v32 = vadd.f32 1.0, %v1039_v28  ;;  %1050 = vrcp.f32 %v681_v27 }
 0x1ca   :  { %v1043_v33 = vpop.eup %1042  ;;  %v533_v36 = vadd.f32 1.0, %v1041_v30 }
 0x1cb   :  { %1052 = vrcp.f32 %v680_v32  ;;  %v683_v34 = vadd.f32 1.0, %v1043_v33 }
 0x1cc   :  { %v1045_v35 = vpop.eup %1044  ;;  %1054 = vrcp.f32 %v531_v29 }
 0x1cd   :  { %1056 = vrcp.f32 %v532_v31  ;;  %v682_v37 = vadd.f32 1.0, %v1045_v35  ;;  %v1047_v38 = vpop.eup %1046 }
 0x1ce   :  { %1058 = vrcp.f32 %v683_v34  ;;  %v708_v47 = vadd.f32 1.0, %v1047_v38 }
 0x1cf   :  { %1060 = vrcp.f32 %v682_v37 }
 0x1d0   :  { %1062 = vrcp.f32 %v533_v36  ;;  %v1049_v39 = vpop.eup %1048 }
 0x1d1   :  { %1064 = vrcp.f32 %v708_v47 }
 0x1d6   :  { %v1051_v40 = vpop.eup %1050 }
 0x1d8   :  { %v1053_v41 = vpop.eup %1052 }
 0x1d9   :  { %v1055_v42 = vpop.eup %1054  ;;  %v692_v43 = vmul.f32 %v1053_v41, %v1049_v39 }
 0x1da   :  { %v1057_v44 = vpop.eup %1056  ;;  %v693_v46 = vmul.f32 %v1055_v42, %v1051_v40 }
 0x1db   :  { %v1059_v45 = vpop.eup %1058 }
 0x1dc   :  { %v1061_v48 = vpop.eup %1060  ;;  %v696_v49 = vadd.f32 %v693_v46, %v692_v43 }
 0x1dd   :  { %v694_v50 = vmul.f32 %v1061_v48, %v1057_v44  ;;  %v1063_v51 = vpop.eup %1062 }
 0x1de   :  { %v695_v52 = vmul.f32 %v1063_v51, %v1059_v45  ;;  %v1065_v60 = vpop.eup %1064 }
 0x1df   :  { %v697_v53 = vadd.f32 %v696_v49, %v694_v50 }
 0x1e1   :  { %v698_v54 = vadd.f32 %v697_v53, %v695_v52 }
 0x1e3   :  { %v699_v55 = vrot.slane %v698_v54, 4 }
 0x1e5   :  { %v700_v56 = vadd.f32 %v699_v55, %v698_v54 }
 0x1e7   :  { %v701_v57 = vrot.slane %v700_v56, 2 }
 0x1e9   :  { %v702_v58 = vadd.f32 %v701_v57, %v700_v56 }
 0x1eb   :  { %v703_v59 = vrot.slane %v702_v58, 1 }
 0x1ed   :  { %v704_v61 = vadd.f32 %v703_v59, %v702_v58 }
 0x1ef   :  { %v711_v62 = vsub.f32 %v704_v61, %v1065_v60 }
 0x1f1   :  { %v822_v63 = vmul.f32 -1.442695, %v711_v62 }
 0x1f3   :  { %1066 = vpow2.f32 %v822_v63 }
 0x200   :  { %v1067_v0 = vpop.eup %1066 }
 0x201   :  { %v715_v1 = vadd.f32 1.0, %v1067_v0 }
 0x203   :  { %1068 = vrcp.f32 %v715_v1 }
 0x210   :  { %v1069_v2 = vpop.eup %1068 }
 0x211   :  { %718 = vst [vmem:[%s1554_s9] sm:$0x1] %v1069_v2 }

</bundles_post_ra>
